<compile_context>
chip_gen: v7x
topology: tpu7x:2x2x1
jax: 0.10.0
libtpu: 0.0.40
codegen_flags: <defaults>
</compile_context>

<pallas_src>
import functools
import math

import jax
import jax.numpy as jnp
from jax import lax
from jax.experimental import pallas as pl
from jax.experimental.pallas import tpu as pltpu

LN_EPS = 1e-5  # torch.nn.LayerNorm default


@functools.lru_cache(maxsize=None)
def _vmem_limit_bytes():
    """Per-generation scoped-VMEM budget (v5e/v6e: 128 MiB phys, v7x: 64 MiB)."""
    cap = 64 << 20  # conservative fallback = v7x physical VMEM
    try:
        info = pltpu.get_tpu_info()
        cap = int(getattr(info, "vmem_capacity_bytes", cap) or cap)
    except Exception:
        pass
    # 3/4 of physical, capped at 100 MiB -> ~96 MiB on v5e/v6e, ~48 MiB on v7x.
    return int(min(cap * 3 // 4, 100 << 20))


# ---------------------------------------------------------------------------
# helpers (traced inside kernels)
# ---------------------------------------------------------------------------
def _layernorm_f32(z, g, b):
    mu = jnp.mean(z, axis=-1, keepdims=True)
    zc = z - mu
    var = jnp.mean(zc * zc, axis=-1, keepdims=True)
    return zc * lax.rsqrt(var + LN_EPS) * g + b


def _gelu_exact(y):
    # nn.GELU() default = exact erf formulation
    return 0.5 * y * (1.0 + lax.erf(y * 0.7071067811865476))


# ---------------------------------------------------------------------------
# Kernel 1: QKV + attention + out-proj + LN1 (one batch element per grid step)
# ---------------------------------------------------------------------------
def _attn_block_kernel(x_ref, wqkv_ref, bqkv_ref, wo_ref, bo_ref, g1_ref, b1_ref,
                       out1_ref, y_ref, attn_acc, *, num_heads, scale):
    S, D = x_ref.shape
    dh = D // num_heads

    x = x_ref[...]                                   # (S, D) f32

    # Fused Q/K/V projection: one MXU pass with a 3D-wide N dimension.
    qkv = jnp.dot(x.astype(jnp.bfloat16), wqkv_ref[...],
                  preferred_element_type=jnp.float32) + bqkv_ref[...]   # (S, 3D) f32

    # Fold the 1/sqrt(dh) scale into q (one (S, D) multiply), then cast the
    # activations to bf16 exactly once.
    q = (qkv[:, 0:D] * scale).astype(jnp.bfloat16)   # (S, D)  bf16
    kv = qkv[:, D:3 * D].astype(jnp.bfloat16)        # (S, 2D) bf16: [k | v]

    # Per-head scaled-dot-product attention.  Heads are lane slices (no XLA
    # transposes); each head writes its columns of an (S, D) VMEM scratch.
    for h in range(num_heads):
        lo = h * dh
        qh = q[:, lo:lo + dh]
        kh = kv[:, lo:lo + dh]
        vh = kv[:, D + lo:D + lo + dh]
        # contract last axes directly (no explicit .T / XLU transpose)
        s = lax.dot_general(qh, kh, (((1,), (1,)), ((), ())),
                            preferred_element_type=jnp.float32)         # (S, S) f32
        p = jnp.exp(s - jnp.max(s, axis=-1, keepdims=True))             # unnormalized
        denom = jnp.sum(p, axis=-1, keepdims=True)                      # (S, 1)
        acc = jnp.dot(p.astype(jnp.bfloat16), vh,
                      preferred_element_type=jnp.float32)               # (S, dh) f32
        # deferred softmax normalization: S*dh multiplies instead of S*S
        attn_acc[:, lo:lo + dh] = acc * pl.reciprocal(denom, approx=True)

    # MultiheadAttention_Out projection from the lane-dense scratch.
    out1 = jnp.dot(attn_acc[...].astype(jnp.bfloat16), wo_ref[...],
                   preferred_element_type=jnp.float32) + bo_ref[...]    # (S, D) f32

    out1_ref[...] = out1                                        # residual #2 (f32)
    y = _layernorm_f32(x + out1, g1_ref[...], b1_ref[...])      # norm1(input + out1)
    y_ref[...] = y.astype(y_ref.dtype)                          # bf16 writeback


def attention_block(x_snd, wqkv, bqkv, wo, bo, g1, b1, *, num_heads):
    """Returns (out1_rows, y_rows, rows_are_sn_ordered)."""
    S, N, D = x_snd.shape
    dh = D // num_heads
    scale = 1.0 / math.sqrt(dh)
    kernel = functools.partial(_attn_block_kernel, num_heads=num_heads, scale=scale)

    # Lane-sliced path: view (S, N, D) as (S, N*D) (free reshape) and slice
    # batch n as lane block n -> no XLA transposes.  Requires 128-aligned D.
    lane_path = (D % 128 == 0) or (N == 1)
    if lane_path:
        x2 = x_snd.reshape(S, N * D)
        xspec = pl.BlockSpec((S, D), lambda n: (0, n))
        out_shape2 = (S, N * D)
    else:
        # Fallback: one explicit transpose to (N, S, D) -> (N*S, D) rows.
        x2 = jnp.transpose(x_snd, (1, 0, 2)).reshape(N * S, D)
        xspec = pl.BlockSpec((S, D), lambda n: (n, 0))
        out_shape2 = (N * S, D)

    # Constant-index weights / biases: single-buffered (no dead second copy).
    def wspec(r, c):
        return pl.BlockSpec((r, c), lambda n: (0, 0), pipeline_mode=pl.Buffered(1))

    flops = N * (2 * S * D * (3 * D)      # QKV projection
                 + 4 * S * S * D          # QK^T and PV over all heads
                 + 2 * S * D * D)         # output projection
    transcendentals = N * (num_heads * S * S + S)
    bytes_accessed = (N * S * D * (4 + 4 + 2)
                      + (D * 3 * D + D * D) * 2
                      + (3 * D + D + 2 * D) * 4)
    cost = pl.CostEstimate(flops=flops, transcendentals=transcendentals,
                           bytes_accessed=bytes_accessed)

    out1, y = pl.pallas_call(
        kernel,
        out_shape=[jax.ShapeDtypeStruct(out_shape2, jnp.float32),   # out1 (f32)
                   jax.ShapeDtypeStruct(out_shape2, jnp.bfloat16)], # y = LN1 out (bf16)
        grid=(N,),
        in_specs=[xspec,
                  wspec(D, 3 * D), wspec(1, 3 * D),
                  wspec(D, D), wspec(1, D),
                  wspec(1, D), wspec(1, D)],
        out_specs=[xspec, xspec],
        scratch_shapes=[pltpu.VMEM((S, D), jnp.float32)],   # per-head accumulator
        compiler_params=pltpu.CompilerParams(
            dimension_semantics=("parallel",),
            vmem_limit_bytes=_vmem_limit_bytes()),
        cost_estimate=cost,
    )(x2, wqkv, bqkv.reshape(1, -1), wo, bo.reshape(1, -1),
      g1.reshape(1, -1), b1.reshape(1, -1))

    if lane_path:
        # (S, N*D) -> (S*N, D) is a free row-major reshape; rows ordered (s, n).
        return out1.reshape(S * N, D), y.reshape(S * N, D), True
    return out1, y, False                                    # rows ordered (n, s)


# ---------------------------------------------------------------------------
# Kernel 2: FFN (W1 + GELU + W2) + residual(out1) + LN2 (row-tiled)
# ---------------------------------------------------------------------------
def _ffn_ln2_kernel(y_ref, out1_ref, w1_ref, b1_ref, w2_ref, b2_ref,
                    g2_ref, bb2_ref, o_ref):
    y = y_ref[...]                                  # (tm, D) already bf16
    h = jnp.dot(y, w1_ref[...], preferred_element_type=jnp.float32) + b1_ref[...]
    h = _gelu_exact(h)                              # (tm, F) f32
    out2 = jnp.dot(h.astype(jnp.bfloat16), w2_ref[...],
                   preferred_element_type=jnp.float32) + b2_ref[...]
    # Residual uses out1 (un-normalized attention output) — as in the reference.
    z = out1_ref[...] + out2
    o_ref[...] = _layernorm_f32(z, g2_ref[...], bb2_ref[...])


def ffn_ln2(y_rows, out1_rows, w1, b1, w2, b2, g2, b2ln):
    T, D = y_rows.shape
    F = w1.shape[1]
    vmem_limit = _vmem_limit_bytes()

    # Pick the largest row tile that divides T AND fits the per-generation
    # VMEM budget: weights are single-buffered (Buffered(1)), row tiles are
    # double-buffered, plus the (tm, F) f32 GELU intermediate.
    budget = int(vmem_limit * 0.7)
    weight_bytes = 2 * D * F * 2                     # w1 + w2 in bf16
    tm = T
    for cand in (1024, 512, 256, 128, 64, 32, 16, 8):
        if T % cand != 0:
            continue
        per_tile = cand * D * (2 + 4 + 4) * 2 + cand * F * 4
        if weight_bytes + per_tile <= budget:
            tm = cand
            break

    rowspec = pl.BlockSpec((tm, D), lambda i: (i, 0))

    def wspec(r, c):
        return pl.BlockSpec((r, c), lambda i: (0, 0), pipeline_mode=pl.Buffered(1))

    cost = pl.CostEstimate(flops=4 * T * D * F,
                           transcendentals=T * F,
                           bytes_accessed=T * D * (2 + 4 + 4)
                           + 2 * D * F * 2 + (F + 3 * D) * 4)

    return pl.pallas_call(
        _ffn_ln2_kernel,
        out_shape=jax.ShapeDtypeStruct((T, D), jnp.float32),
        grid=(T // tm,),
        in_specs=[rowspec, rowspec,
                  wspec(D, F), wspec(1, F),
                  wspec(F, D), wspec(1, D),
                  wspec(1, D), wspec(1, D)],
        out_specs=rowspec,
        compiler_params=pltpu.CompilerParams(
            dimension_semantics=("parallel",),
            vmem_limit_bytes=vmem_limit),
        cost_estimate=cost,
    )(y_rows, out1_rows, w1, b1.reshape(1, F), w2, b2.reshape(1, D),
      g2.reshape(1, D), b2ln.reshape(1, D))


# ---------------------------------------------------------------------------
# EncoderLayer forward + params
# ---------------------------------------------------------------------------
def init_params(key, d_model, num_heads, dim_ff):
    assert d_model % num_heads == 0
    keys = iter(jax.random.split(key, 4))
    nrm = lambda shape: 0.02 * jax.random.normal(next(keys), shape, jnp.float32)
    zeros = lambda n: jnp.zeros((n,), jnp.float32)
    ones = lambda n: jnp.ones((n,), jnp.float32)
    return {
        # fused Q/K/V projection weight (D, 3D); matmul weights kept in bf16
        "wqkv": nrm((d_model, 3 * d_model)).astype(jnp.bfloat16),
        "bqkv": zeros(3 * d_model),
        "wo": nrm((d_model, d_model)).astype(jnp.bfloat16),
        "bo": zeros(d_model),
        "w1": nrm((d_model, dim_ff)).astype(jnp.bfloat16),
        "b1": zeros(dim_ff),
        "w2": nrm((dim_ff, d_model)).astype(jnp.bfloat16),
        "b2": zeros(d_model),
        "ln1_g": ones(d_model), "ln1_b": zeros(d_model),
        "ln2_g": ones(d_model), "ln2_b": zeros(d_model),
    }


def encoder_layer(x_snd, params, *, num_heads):
    """x_snd: (S, N, D) float32, seq-first like the PyTorch reference."""
    S, N, D = x_snd.shape

    out1_rows, y_rows, sn_order = attention_block(
        x_snd, params["wqkv"], params["bqkv"], params["wo"], params["bo"],
        params["ln1_g"], params["ln1_b"], num_heads=num_heads)

    out_rows = ffn_ln2(
        y_rows, out1_rows,
        params["w1"], params["b1"], params["w2"], params["b2"],
        params["ln2_g"], params["ln2_b"])

    if sn_order:
        # rows are already (s, n)-ordered -> free reshape, no exit transpose
        return out_rows.reshape(S, N, D)
    return jnp.transpose(out_rows.reshape(N, S, D), (1, 0, 2))


# ---------------------------------------------------------------------------
if __name__ == "__main__":
    d_model, num_heads, dim_ff = 128, 4, 256
    S, N = 8, 2  # seq-first, like the PyTorch reference

    key = jax.random.PRNGKey(0)
    kp, kx = jax.random.split(key)
    params = init_params(kp, d_model, num_heads, dim_ff)
    x = jax.random.normal(kx, (S, N, d_model), jnp.float32)

    fwd = jax.jit(functools.partial(encoder_layer, num_heads=num_heads))
    out = fwd(x, params)
    jax.block_until_ready(out)

    assert out.shape == (S, N, d_model)
    assert out.dtype == jnp.float32
    assert bool(jnp.all(jnp.isfinite(out)))
    print("KERNEL_OK")
</pallas_src>

<mosaic_0001>
module attributes {stable_mosaic.version = 11 : i64} {
  func.func @_attn_block_kernel(%arg0: i32, %arg1: memref<8x128xf32, #tpu.memory_space<vmem>>, %arg2: memref<128x384xbf16, #tpu.memory_space<vmem>>, %arg3: memref<1x384xf32, #tpu.memory_space<vmem>>, %arg4: memref<128x128xbf16, #tpu.memory_space<vmem>>, %arg5: memref<1x128xf32, #tpu.memory_space<vmem>>, %arg6: memref<1x128xf32, #tpu.memory_space<vmem>>, %arg7: memref<1x128xf32, #tpu.memory_space<vmem>>, %arg8: memref<8x128xf32, #tpu.memory_space<vmem>>, %arg9: memref<8x128xbf16, #tpu.memory_space<vmem>>, %arg10: memref<8x128xf32, #tpu.memory_space<vmem>>) attributes {dimension_semantics = [#tpu.dimension_semantics<parallel>], iteration_bounds = array<i64: 2>, scalar_prefetch = 0 : i64, scratch_operands = 1 : i64, tpu.core_type = #tpu.core_type<tc>, window_params = [{transform_indices = @transform_0, window_bounds = array<i64: 8, 128>}, {pipeline_mode = #tpu.pipeline_mode<synchronous>, transform_indices = @transform_1, window_bounds = array<i64: 128, 384>}, {pipeline_mode = #tpu.pipeline_mode<synchronous>, transform_indices = @transform_2, window_bounds = array<i64: 1, 384>}, {pipeline_mode = #tpu.pipeline_mode<synchronous>, transform_indices = @transform_3, window_bounds = array<i64: 128, 128>}, {pipeline_mode = #tpu.pipeline_mode<synchronous>, transform_indices = @transform_4, window_bounds = array<i64: 1, 128>}, {pipeline_mode = #tpu.pipeline_mode<synchronous>, transform_indices = @transform_5, window_bounds = array<i64: 1, 128>}, {pipeline_mode = #tpu.pipeline_mode<synchronous>, transform_indices = @transform_6, window_bounds = array<i64: 1, 128>}, {transform_indices = @transform_7, window_bounds = array<i64: 8, 128>}, {transform_indices = @transform_8, window_bounds = array<i64: 8, 128>}]} {
    %c0 = arith.constant 0 : index
    %c0_0 = arith.constant 0 : index
    %0 = vector.load %arg1[%c0, %c0_0] : memref<8x128xf32, #tpu.memory_space<vmem>>, vector<8x128xf32>
    %1 = arith.truncf %0 : vector<8x128xf32> to vector<8x128xbf16>
    %c0_1 = arith.constant 0 : index
    %c0_2 = arith.constant 0 : index
    %2 = vector.load %arg2[%c0_1, %c0_2] : memref<128x384xbf16, #tpu.memory_space<vmem>>, vector<128x384xbf16>
    %cst = arith.constant dense<0.000000e+00> : vector<8x384xf32>
    %3 = tpu.matmul %1, %2, %cst {dimension_numbers = #tpu.dot_dimension_numbers<[1], [0], [0], [1], [0, 0, 1, 1], [], []>} : vector<8x128xbf16>, vector<128x384xbf16>, vector<8x384xf32> -> vector<8x384xf32>
    %c0_3 = arith.constant 0 : index
    %c0_4 = arith.constant 0 : index
    %4 = vector.load %arg3[%c0_3, %c0_4] : memref<1x384xf32, #tpu.memory_space<vmem>>, vector<1x384xf32>
    %5 = vector.broadcast %4 : vector<1x384xf32> to vector<8x384xf32>
    %6 = arith.addf %3, %5 : vector<8x384xf32>
    %7 = vector.extract_strided_slice %6 {offsets = [0, 0], sizes = [8, 128], strides = [1, 1]} : vector<8x384xf32> to vector<8x128xf32>
    %cst_5 = arith.constant 0.176776692 : f32
    %8 = vector.broadcast %cst_5 : f32 to vector<8x128xf32>
    %9 = arith.mulf %7, %8 : vector<8x128xf32>
    %10 = arith.truncf %9 : vector<8x128xf32> to vector<8x128xbf16>
    %11 = vector.extract_strided_slice %6 {offsets = [0, 128], sizes = [8, 256], strides = [1, 1]} : vector<8x384xf32> to vector<8x256xf32>
    %12 = arith.truncf %11 : vector<8x256xf32> to vector<8x256xbf16>
    %13 = vector.extract_strided_slice %10 {offsets = [0, 0], sizes = [8, 32], strides = [1, 1]} : vector<8x128xbf16> to vector<8x32xbf16>
    %14 = vector.extract_strided_slice %12 {offsets = [0, 0], sizes = [8, 32], strides = [1, 1]} : vector<8x256xbf16> to vector<8x32xbf16>
    %15 = vector.extract_strided_slice %12 {offsets = [0, 128], sizes = [8, 32], strides = [1, 1]} : vector<8x256xbf16> to vector<8x32xbf16>
    %cst_6 = arith.constant dense<0.000000e+00> : vector<8x8xf32>
    %16 = tpu.matmul %13, %14, %cst_6 {dimension_numbers = #tpu.dot_dimension_numbers<[1], [1], [0], [0], [0, 0, 1, 0], [], []>} : vector<8x32xbf16>, vector<8x32xbf16>, vector<8x8xf32> -> vector<8x8xf32>
    %cst_7 = arith.constant dense<0xFF800000> : vector<8xf32>
    %17 = vector.multi_reduction <maximumf>, %16, %cst_7 [1] : vector<8x8xf32> to vector<8xf32>
    %18 = vector.shape_cast %17 : vector<8xf32> to vector<8x1xf32>
    %19 = vector.broadcast %18 : vector<8x1xf32> to vector<8x8xf32>
    %20 = arith.subf %16, %19 : vector<8x8xf32>
    %21 = math.exp %20 : vector<8x8xf32>
    %cst_8 = arith.constant dense<0.000000e+00> : vector<8xf32>
    %22 = vector.multi_reduction <add>, %21, %cst_8 [1] : vector<8x8xf32> to vector<8xf32>
    %23 = vector.shape_cast %22 : vector<8xf32> to vector<8x1xf32>
    %24 = arith.truncf %21 : vector<8x8xf32> to vector<8x8xbf16>
    %cst_9 = arith.constant dense<0.000000e+00> : vector<8x32xf32>
    %25 = tpu.matmul %24, %15, %cst_9 {dimension_numbers = #tpu.dot_dimension_numbers<[1], [0], [0], [1], [0, 0, 1, 1], [], []>} : vector<8x8xbf16>, vector<8x32xbf16>, vector<8x32xf32> -> vector<8x32xf32>
    %26 = tpu.reciprocal %23 {approx = true} : vector<8x1xf32> -> vector<8x1xf32>
    %27 = vector.broadcast %26 : vector<8x1xf32> to vector<8x32xf32>
    %28 = arith.mulf %25, %27 : vector<8x32xf32>
    %c0_10 = arith.constant 0 : index
    %c0_11 = arith.constant 0 : index
    %29 = vector.load %arg10[%c0_10, %c0_11] : memref<8x128xf32, #tpu.memory_space<vmem>>, vector<8x32xf32>
    tpu.vector_store %arg10[%c0_10, %c0_11], %28 {strides = array<i32>} : memref<8x128xf32, #tpu.memory_space<vmem>>, vector<8x32xf32>,
    %30 = vector.extract_strided_slice %10 {offsets = [0, 32], sizes = [8, 32], strides = [1, 1]} : vector<8x128xbf16> to vector<8x32xbf16>
    %31 = vector.extract_strided_slice %12 {offsets = [0, 32], sizes = [8, 32], strides = [1, 1]} : vector<8x256xbf16> to vector<8x32xbf16>
    %32 = vector.extract_strided_slice %12 {offsets = [0, 160], sizes = [8, 32], strides = [1, 1]} : vector<8x256xbf16> to vector<8x32xbf16>
    %cst_12 = arith.constant dense<0.000000e+00> : vector<8x8xf32>
    %33 = tpu.matmul %30, %31, %cst_12 {dimension_numbers = #tpu.dot_dimension_numbers<[1], [1], [0], [0], [0, 0, 1, 0], [], []>} : vector<8x32xbf16>, vector<8x32xbf16>, vector<8x8xf32> -> vector<8x8xf32>
    %cst_13 = arith.constant dense<0xFF800000> : vector<8xf32>
    %34 = vector.multi_reduction <maximumf>, %33, %cst_13 [1] : vector<8x8xf32> to vector<8xf32>
    %35 = vector.shape_cast %34 : vector<8xf32> to vector<8x1xf32>
    %36 = vector.broadcast %35 : vector<8x1xf32> to vector<8x8xf32>
    %37 = arith.subf %33, %36 : vector<8x8xf32>
    %38 = math.exp %37 : vector<8x8xf32>
    %cst_14 = arith.constant dense<0.000000e+00> : vector<8xf32>
    %39 = vector.multi_reduction <add>, %38, %cst_14 [1] : vector<8x8xf32> to vector<8xf32>
    %40 = vector.shape_cast %39 : vector<8xf32> to vector<8x1xf32>
    %41 = arith.truncf %38 : vector<8x8xf32> to vector<8x8xbf16>
    %cst_15 = arith.constant dense<0.000000e+00> : vector<8x32xf32>
    %42 = tpu.matmul %41, %32, %cst_15 {dimension_numbers = #tpu.dot_dimension_numbers<[1], [0], [0], [1], [0, 0, 1, 1], [], []>} : vector<8x8xbf16>, vector<8x32xbf16>, vector<8x32xf32> -> vector<8x32xf32>
    %43 = tpu.reciprocal %40 {approx = true} : vector<8x1xf32> -> vector<8x1xf32>
    %44 = vector.broadcast %43 : vector<8x1xf32> to vector<8x32xf32>
    %45 = arith.mulf %42, %44 : vector<8x32xf32>
    %c0_16 = arith.constant 0 : index
    %c32 = arith.constant 32 : index
    %46 = vector.load %arg10[%c0_16, %c32] : memref<8x128xf32, #tpu.memory_space<vmem>>, vector<8x32xf32>
    tpu.vector_store %arg10[%c0_16, %c32], %45 {strides = array<i32>} : memref<8x128xf32, #tpu.memory_space<vmem>>, vector<8x32xf32>,
    %47 = vector.extract_strided_slice %10 {offsets = [0, 64], sizes = [8, 32], strides = [1, 1]} : vector<8x128xbf16> to vector<8x32xbf16>
    %48 = vector.extract_strided_slice %12 {offsets = [0, 64], sizes = [8, 32], strides = [1, 1]} : vector<8x256xbf16> to vector<8x32xbf16>
    %49 = vector.extract_strided_slice %12 {offsets = [0, 192], sizes = [8, 32], strides = [1, 1]} : vector<8x256xbf16> to vector<8x32xbf16>
    %cst_17 = arith.constant dense<0.000000e+00> : vector<8x8xf32>
    %50 = tpu.matmul %47, %48, %cst_17 {dimension_numbers = #tpu.dot_dimension_numbers<[1], [1], [0], [0], [0, 0, 1, 0], [], []>} : vector<8x32xbf16>, vector<8x32xbf16>, vector<8x8xf32> -> vector<8x8xf32>
    %cst_18 = arith.constant dense<0xFF800000> : vector<8xf32>
    %51 = vector.multi_reduction <maximumf>, %50, %cst_18 [1] : vector<8x8xf32> to vector<8xf32>
    %52 = vector.shape_cast %51 : vector<8xf32> to vector<8x1xf32>
    %53 = vector.broadcast %52 : vector<8x1xf32> to vector<8x8xf32>
    %54 = arith.subf %50, %53 : vector<8x8xf32>
    %55 = math.exp %54 : vector<8x8xf32>
    %cst_19 = arith.constant dense<0.000000e+00> : vector<8xf32>
    %56 = vector.multi_reduction <add>, %55, %cst_19 [1] : vector<8x8xf32> to vector<8xf32>
    %57 = vector.shape_cast %56 : vector<8xf32> to vector<8x1xf32>
    %58 = arith.truncf %55 : vector<8x8xf32> to vector<8x8xbf16>
    %cst_20 = arith.constant dense<0.000000e+00> : vector<8x32xf32>
    %59 = tpu.matmul %58, %49, %cst_20 {dimension_numbers = #tpu.dot_dimension_numbers<[1], [0], [0], [1], [0, 0, 1, 1], [], []>} : vector<8x8xbf16>, vector<8x32xbf16>, vector<8x32xf32> -> vector<8x32xf32>
    %60 = tpu.reciprocal %57 {approx = true} : vector<8x1xf32> -> vector<8x1xf32>
    %61 = vector.broadcast %60 : vector<8x1xf32> to vector<8x32xf32>
    %62 = arith.mulf %59, %61 : vector<8x32xf32>
    %c0_21 = arith.constant 0 : index
    %c64 = arith.constant 64 : index
    %63 = vector.load %arg10[%c0_21, %c64] : memref<8x128xf32, #tpu.memory_space<vmem>>, vector<8x32xf32>
    tpu.vector_store %arg10[%c0_21, %c64], %62 {strides = array<i32>} : memref<8x128xf32, #tpu.memory_space<vmem>>, vector<8x32xf32>,
    %64 = vector.extract_strided_slice %10 {offsets = [0, 96], sizes = [8, 32], strides = [1, 1]} : vector<8x128xbf16> to vector<8x32xbf16>
    %65 = vector.extract_strided_slice %12 {offsets = [0, 96], sizes = [8, 32], strides = [1, 1]} : vector<8x256xbf16> to vector<8x32xbf16>
    %66 = vector.extract_strided_slice %12 {offsets = [0, 224], sizes = [8, 32], strides = [1, 1]} : vector<8x256xbf16> to vector<8x32xbf16>
    %cst_22 = arith.constant dense<0.000000e+00> : vector<8x8xf32>
    %67 = tpu.matmul %64, %65, %cst_22 {dimension_numbers = #tpu.dot_dimension_numbers<[1], [1], [0], [0], [0, 0, 1, 0], [], []>} : vector<8x32xbf16>, vector<8x32xbf16>, vector<8x8xf32> -> vector<8x8xf32>
    %cst_23 = arith.constant dense<0xFF800000> : vector<8xf32>
    %68 = vector.multi_reduction <maximumf>, %67, %cst_23 [1] : vector<8x8xf32> to vector<8xf32>
    %69 = vector.shape_cast %68 : vector<8xf32> to vector<8x1xf32>
    %70 = vector.broadcast %69 : vector<8x1xf32> to vector<8x8xf32>
    %71 = arith.subf %67, %70 : vector<8x8xf32>
    %72 = math.exp %71 : vector<8x8xf32>
    %cst_24 = arith.constant dense<0.000000e+00> : vector<8xf32>
    %73 = vector.multi_reduction <add>, %72, %cst_24 [1] : vector<8x8xf32> to vector<8xf32>
    %74 = vector.shape_cast %73 : vector<8xf32> to vector<8x1xf32>
    %75 = arith.truncf %72 : vector<8x8xf32> to vector<8x8xbf16>
    %cst_25 = arith.constant dense<0.000000e+00> : vector<8x32xf32>
    %76 = tpu.matmul %75, %66, %cst_25 {dimension_numbers = #tpu.dot_dimension_numbers<[1], [0], [0], [1], [0, 0, 1, 1], [], []>} : vector<8x8xbf16>, vector<8x32xbf16>, vector<8x32xf32> -> vector<8x32xf32>
    %77 = tpu.reciprocal %74 {approx = true} : vector<8x1xf32> -> vector<8x1xf32>
    %78 = vector.broadcast %77 : vector<8x1xf32> to vector<8x32xf32>
    %79 = arith.mulf %76, %78 : vector<8x32xf32>
    %c0_26 = arith.constant 0 : index
    %c96 = arith.constant 96 : index
    %80 = vector.load %arg10[%c0_26, %c96] : memref<8x128xf32, #tpu.memory_space<vmem>>, vector<8x32xf32>
    tpu.vector_store %arg10[%c0_26, %c96], %79 {strides = array<i32>} : memref<8x128xf32, #tpu.memory_space<vmem>>, vector<8x32xf32>,
    %c0_27 = arith.constant 0 : index
    %c0_28 = arith.constant 0 : index
    %81 = vector.load %arg10[%c0_27, %c0_28] : memref<8x128xf32, #tpu.memory_space<vmem>>, vector<8x128xf32>
    %82 = arith.truncf %81 : vector<8x128xf32> to vector<8x128xbf16>
    %c0_29 = arith.constant 0 : index
    %c0_30 = arith.constant 0 : index
    %83 = vector.load %arg4[%c0_29, %c0_30] : memref<128x128xbf16, #tpu.memory_space<vmem>>, vector<128x128xbf16>
    %cst_31 = arith.constant dense<0.000000e+00> : vector<8x128xf32>
    %84 = tpu.matmul %82, %83, %cst_31 {dimension_numbers = #tpu.dot_dimension_numbers<[1], [0], [0], [1], [0, 0, 1, 1], [], []>} : vector<8x128xbf16>, vector<128x128xbf16>, vector<8x128xf32> -> vector<8x128xf32>
    %c0_32 = arith.constant 0 : index
    %c0_33 = arith.constant 0 : index
    %85 = vector.load %arg5[%c0_32, %c0_33] : memref<1x128xf32, #tpu.memory_space<vmem>>, vector<1x128xf32>
    %86 = vector.broadcast %85 : vector<1x128xf32> to vector<8x128xf32>
    %87 = arith.addf %84, %86 : vector<8x128xf32>
    %c0_34 = arith.constant 0 : index
    %c0_35 = arith.constant 0 : index
    %88 = vector.load %arg8[%c0_34, %c0_35] : memref<8x128xf32, #tpu.memory_space<vmem>>, vector<8x128xf32>
    tpu.vector_store %arg8[%c0_34, %c0_35], %87 {strides = array<i32>} : memref<8x128xf32, #tpu.memory_space<vmem>>, vector<8x128xf32>,
    %89 = arith.addf %0, %87 : vector<8x128xf32>
    %c0_36 = arith.constant 0 : index
    %c0_37 = arith.constant 0 : index
    %90 = vector.load %arg6[%c0_36, %c0_37] : memref<1x128xf32, #tpu.memory_space<vmem>>, vector<1x128xf32>
    %c0_38 = arith.constant 0 : index
    %c0_39 = arith.constant 0 : index
    %91 = vector.load %arg7[%c0_38, %c0_39] : memref<1x128xf32, #tpu.memory_space<vmem>>, vector<1x128xf32>
    %cst_40 = arith.constant dense<0.000000e+00> : vector<8xf32>
    %92 = vector.multi_reduction <add>, %89, %cst_40 [1] : vector<8x128xf32> to vector<8xf32>
    %93 = vector.shape_cast %92 : vector<8xf32> to vector<8x1xf32>
    %cst_41 = arith.constant 1.280000e+02 : f32
    %94 = vector.broadcast %cst_41 : f32 to vector<8x1xf32>
    %95 = arith.divf %93, %94 : vector<8x1xf32>
    %96 = vector.broadcast %95 : vector<8x1xf32> to vector<8x128xf32>
    %97 = arith.subf %89, %96 : vector<8x128xf32>
    %98 = arith.mulf %97, %97 : vector<8x128xf32>
    %cst_42 = arith.constant dense<0.000000e+00> : vector<8xf32>
    %99 = vector.multi_reduction <add>, %98, %cst_42 [1] : vector<8x128xf32> to vector<8xf32>
    %100 = vector.shape_cast %99 : vector<8xf32> to vector<8x1xf32>
    %cst_43 = arith.constant 1.280000e+02 : f32
    %101 = vector.broadcast %cst_43 : f32 to vector<8x1xf32>
    %102 = arith.divf %100, %101 : vector<8x1xf32>
    %cst_44 = arith.constant 9.99999974E-6 : f32
    %103 = vector.broadcast %cst_44 : f32 to vector<8x1xf32>
    %104 = arith.addf %102, %103 : vector<8x1xf32>
    %105 = math.rsqrt %104 : vector<8x1xf32>
    %106 = vector.broadcast %105 : vector<8x1xf32> to vector<8x128xf32>
    %107 = arith.mulf %97, %106 : vector<8x128xf32>
    %108 = vector.broadcast %90 : vector<1x128xf32> to vector<8x128xf32>
    %109 = arith.mulf %107, %108 : vector<8x128xf32>
    %110 = vector.broadcast %91 : vector<1x128xf32> to vector<8x128xf32>
    %111 = arith.addf %109, %110 : vector<8x128xf32>
    %112 = arith.truncf %111 : vector<8x128xf32> to vector<8x128xbf16>
    %c0_45 = arith.constant 0 : index
    %c0_46 = arith.constant 0 : index
    %113 = vector.load %arg9[%c0_45, %c0_46] : memref<8x128xbf16, #tpu.memory_space<vmem>>, vector<8x128xbf16>
    tpu.vector_store %arg9[%c0_45, %c0_46], %112 {strides = array<i32>} : memref<8x128xbf16, #tpu.memory_space<vmem>>, vector<8x128xbf16>,
    return
  }
  func.func @transform_0(%arg0: i32) -> (i32, i32) {
    %c0_i32 = arith.constant 0 : i32
    %c0_i32_0 = arith.constant 0 : i32
    return %c0_i32, %arg0 : i32, i32
  }
  func.func @transform_1(%arg0: i32) -> (i32, i32) {
    %c0_i32 = arith.constant 0 : i32
    %c0_i32_0 = arith.constant 0 : i32
    %c0_i32_1 = arith.constant 0 : i32
    return %c0_i32, %c0_i32_0 : i32, i32
  }
  func.func @transform_2(%arg0: i32) -> (i32, i32) {
    %c0_i32 = arith.constant 0 : i32
    %c0_i32_0 = arith.constant 0 : i32
    %c0_i32_1 = arith.constant 0 : i32
    return %c0_i32, %c0_i32_0 : i32, i32
  }
  func.func @transform_3(%arg0: i32) -> (i32, i32) {
    %c0_i32 = arith.constant 0 : i32
    %c0_i32_0 = arith.constant 0 : i32
    %c0_i32_1 = arith.constant 0 : i32
    return %c0_i32, %c0_i32_0 : i32, i32
  }
  func.func @transform_4(%arg0: i32) -> (i32, i32) {
    %c0_i32 = arith.constant 0 : i32
    %c0_i32_0 = arith.constant 0 : i32
    %c0_i32_1 = arith.constant 0 : i32
    return %c0_i32, %c0_i32_0 : i32, i32
  }
  func.func @transform_5(%arg0: i32) -> (i32, i32) {
    %c0_i32 = arith.constant 0 : i32
    %c0_i32_0 = arith.constant 0 : i32
    %c0_i32_1 = arith.constant 0 : i32
    return %c0_i32, %c0_i32_0 : i32, i32
  }
  func.func @transform_6(%arg0: i32) -> (i32, i32) {
    %c0_i32 = arith.constant 0 : i32
    %c0_i32_0 = arith.constant 0 : i32
    %c0_i32_1 = arith.constant 0 : i32
    return %c0_i32, %c0_i32_0 : i32, i32
  }
  func.func @transform_7(%arg0: i32) -> (i32, i32) {
    %c0_i32 = arith.constant 0 : i32
    %c0_i32_0 = arith.constant 0 : i32
    return %c0_i32, %arg0 : i32, i32
  }
  func.func @transform_8(%arg0: i32) -> (i32, i32) {
    %c0_i32 = arith.constant 0 : i32
    %c0_i32_0 = arith.constant 0 : i32
    return %c0_i32, %arg0 : i32, i32
  }
}

module attributes {stable_mosaic.version = 11 : i64} {
  func.func @_ffn_ln2_kernel(%arg0: i32, %arg1: memref<16x128xbf16, #tpu.memory_space<vmem>>, %arg2: memref<16x128xf32, #tpu.memory_space<vmem>>, %arg3: memref<128x256xbf16, #tpu.memory_space<vmem>>, %arg4: memref<1x256xf32, #tpu.memory_space<vmem>>, %arg5: memref<256x128xbf16, #tpu.memory_space<vmem>>, %arg6: memref<1x128xf32, #tpu.memory_space<vmem>>, %arg7: memref<1x128xf32, #tpu.memory_space<vmem>>, %arg8: memref<1x128xf32, #tpu.memory_space<vmem>>, %arg9: memref<16x128xf32, #tpu.memory_space<vmem>>) attributes {dimension_semantics = [#tpu.dimension_semantics<parallel>], iteration_bounds = array<i64: 1>, scalar_prefetch = 0 : i64, scratch_operands = 0 : i64, tpu.core_type = #tpu.core_type<tc>, window_params = [{transform_indices = @transform_0, window_bounds = array<i64: 16, 128>}, {transform_indices = @transform_1, window_bounds = array<i64: 16, 128>}, {pipeline_mode = #tpu.pipeline_mode<synchronous>, transform_indices = @transform_2, window_bounds = array<i64: 128, 256>}, {pipeline_mode = #tpu.pipeline_mode<synchronous>, transform_indices = @transform_3, window_bounds = array<i64: 1, 256>}, {pipeline_mode = #tpu.pipeline_mode<synchronous>, transform_indices = @transform_4, window_bounds = array<i64: 256, 128>}, {pipeline_mode = #tpu.pipeline_mode<synchronous>, transform_indices = @transform_5, window_bounds = array<i64: 1, 128>}, {pipeline_mode = #tpu.pipeline_mode<synchronous>, transform_indices = @transform_6, window_bounds = array<i64: 1, 128>}, {pipeline_mode = #tpu.pipeline_mode<synchronous>, transform_indices = @transform_7, window_bounds = array<i64: 1, 128>}, {transform_indices = @transform_8, window_bounds = array<i64: 16, 128>}]} {
    %c0 = arith.constant 0 : index
    %c0_0 = arith.constant 0 : index
    %0 = vector.load %arg1[%c0, %c0_0] : memref<16x128xbf16, #tpu.memory_space<vmem>>, vector<16x128xbf16>
    %c0_1 = arith.constant 0 : index
    %c0_2 = arith.constant 0 : index
    %1 = vector.load %arg3[%c0_1, %c0_2] : memref<128x256xbf16, #tpu.memory_space<vmem>>, vector<128x256xbf16>
    %cst = arith.constant dense<0.000000e+00> : vector<16x256xf32>
    %2 = tpu.matmul %0, %1, %cst {dimension_numbers = #tpu.dot_dimension_numbers<[1], [0], [0], [1], [0, 0, 1, 1], [], []>} : vector<16x128xbf16>, vector<128x256xbf16>, vector<16x256xf32> -> vector<16x256xf32>
    %c0_3 = arith.constant 0 : index
    %c0_4 = arith.constant 0 : index
    %3 = vector.load %arg4[%c0_3, %c0_4] : memref<1x256xf32, #tpu.memory_space<vmem>>, vector<1x256xf32>
    %4 = vector.broadcast %3 : vector<1x256xf32> to vector<16x256xf32>
    %5 = arith.addf %2, %4 : vector<16x256xf32>
    %cst_5 = arith.constant 5.000000e-01 : f32
    %6 = vector.broadcast %cst_5 : f32 to vector<16x256xf32>
    %7 = arith.mulf %6, %5 : vector<16x256xf32>
    %cst_6 = arith.constant 0.707106769 : f32
    %8 = vector.broadcast %cst_6 : f32 to vector<16x256xf32>
    %9 = arith.mulf %5, %8 : vector<16x256xf32>
    %10 = math.erf %9 : vector<16x256xf32>
    %cst_7 = arith.constant 1.000000e+00 : f32
    %11 = vector.broadcast %cst_7 : f32 to vector<16x256xf32>
    %12 = arith.addf %11, %10 : vector<16x256xf32>
    %13 = arith.mulf %7, %12 : vector<16x256xf32>
    %14 = arith.truncf %13 : vector<16x256xf32> to vector<16x256xbf16>
    %c0_8 = arith.constant 0 : index
    %c0_9 = arith.constant 0 : index
    %15 = vector.load %arg5[%c0_8, %c0_9] : memref<256x128xbf16, #tpu.memory_space<vmem>>, vector<256x128xbf16>
    %cst_10 = arith.constant dense<0.000000e+00> : vector<16x128xf32>
    %16 = tpu.matmul %14, %15, %cst_10 {dimension_numbers = #tpu.dot_dimension_numbers<[1], [0], [0], [1], [0, 0, 1, 1], [], []>} : vector<16x256xbf16>, vector<256x128xbf16>, vector<16x128xf32> -> vector<16x128xf32>
    %c0_11 = arith.constant 0 : index
    %c0_12 = arith.constant 0 : index
    %17 = vector.load %arg6[%c0_11, %c0_12] : memref<1x128xf32, #tpu.memory_space<vmem>>, vector<1x128xf32>
    %18 = vector.broadcast %17 : vector<1x128xf32> to vector<16x128xf32>
    %19 = arith.addf %16, %18 : vector<16x128xf32>
    %c0_13 = arith.constant 0 : index
    %c0_14 = arith.constant 0 : index
    %20 = vector.load %arg2[%c0_13, %c0_14] : memref<16x128xf32, #tpu.memory_space<vmem>>, vector<16x128xf32>
    %21 = arith.addf %20, %19 : vector<16x128xf32>
    %c0_15 = arith.constant 0 : index
    %c0_16 = arith.constant 0 : index
    %22 = vector.load %arg7[%c0_15, %c0_16] : memref<1x128xf32, #tpu.memory_space<vmem>>, vector<1x128xf32>
    %c0_17 = arith.constant 0 : index
    %c0_18 = arith.constant 0 : index
    %23 = vector.load %arg8[%c0_17, %c0_18] : memref<1x128xf32, #tpu.memory_space<vmem>>, vector<1x128xf32>
    %cst_19 = arith.constant dense<0.000000e+00> : vector<16xf32>
    %24 = vector.multi_reduction <add>, %21, %cst_19 [1] : vector<16x128xf32> to vector<16xf32>
    %25 = vector.shape_cast %24 : vector<16xf32> to vector<16x1xf32>
    %cst_20 = arith.constant 1.280000e+02 : f32
    %26 = vector.broadcast %cst_20 : f32 to vector<16x1xf32>
    %27 = arith.divf %25, %26 : vector<16x1xf32>
    %28 = vector.broadcast %27 : vector<16x1xf32> to vector<16x128xf32>
    %29 = arith.subf %21, %28 : vector<16x128xf32>
    %30 = arith.mulf %29, %29 : vector<16x128xf32>
    %cst_21 = arith.constant dense<0.000000e+00> : vector<16xf32>
    %31 = vector.multi_reduction <add>, %30, %cst_21 [1] : vector<16x128xf32> to vector<16xf32>
    %32 = vector.shape_cast %31 : vector<16xf32> to vector<16x1xf32>
    %cst_22 = arith.constant 1.280000e+02 : f32
    %33 = vector.broadcast %cst_22 : f32 to vector<16x1xf32>
    %34 = arith.divf %32, %33 : vector<16x1xf32>
    %cst_23 = arith.constant 9.99999974E-6 : f32
    %35 = vector.broadcast %cst_23 : f32 to vector<16x1xf32>
    %36 = arith.addf %34, %35 : vector<16x1xf32>
    %37 = math.rsqrt %36 : vector<16x1xf32>
    %38 = vector.broadcast %37 : vector<16x1xf32> to vector<16x128xf32>
    %39 = arith.mulf %29, %38 : vector<16x128xf32>
    %40 = vector.broadcast %22 : vector<1x128xf32> to vector<16x128xf32>
    %41 = arith.mulf %39, %40 : vector<16x128xf32>
    %42 = vector.broadcast %23 : vector<1x128xf32> to vector<16x128xf32>
    %43 = arith.addf %41, %42 : vector<16x128xf32>
    %c0_24 = arith.constant 0 : index
    %c0_25 = arith.constant 0 : index
    %44 = vector.load %arg9[%c0_24, %c0_25] : memref<16x128xf32, #tpu.memory_space<vmem>>, vector<16x128xf32>
    tpu.vector_store %arg9[%c0_24, %c0_25], %43 {strides = array<i32>} : memref<16x128xf32, #tpu.memory_space<vmem>>, vector<16x128xf32>,
    return
  }
  func.func @transform_0(%arg0: i32) -> (i32, i32) {
    %c0_i32 = arith.constant 0 : i32
    %c0_i32_0 = arith.constant 0 : i32
    return %arg0, %c0_i32 : i32, i32
  }
  func.func @transform_1(%arg0: i32) -> (i32, i32) {
    %c0_i32 = arith.constant 0 : i32
    %c0_i32_0 = arith.constant 0 : i32
    return %arg0, %c0_i32 : i32, i32
  }
  func.func @transform_2(%arg0: i32) -> (i32, i32) {
    %c0_i32 = arith.constant 0 : i32
    %c0_i32_0 = arith.constant 0 : i32
    %c0_i32_1 = arith.constant 0 : i32
    return %c0_i32, %c0_i32_0 : i32, i32
  }
  func.func @transform_3(%arg0: i32) -> (i32, i32) {
    %c0_i32 = arith.constant 0 : i32
    %c0_i32_0 = arith.constant 0 : i32
    %c0_i32_1 = arith.constant 0 : i32
    return %c0_i32, %c0_i32_0 : i32, i32
  }
  func.func @transform_4(%arg0: i32) -> (i32, i32) {
    %c0_i32 = arith.constant 0 : i32
    %c0_i32_0 = arith.constant 0 : i32
    %c0_i32_1 = arith.constant 0 : i32
    return %c0_i32, %c0_i32_0 : i32, i32
  }
  func.func @transform_5(%arg0: i32) -> (i32, i32) {
    %c0_i32 = arith.constant 0 : i32
    %c0_i32_0 = arith.constant 0 : i32
    %c0_i32_1 = arith.constant 0 : i32
    return %c0_i32, %c0_i32_0 : i32, i32
  }
  func.func @transform_6(%arg0: i32) -> (i32, i32) {
    %c0_i32 = arith.constant 0 : i32
    %c0_i32_0 = arith.constant 0 : i32
    %c0_i32_1 = arith.constant 0 : i32
    return %c0_i32, %c0_i32_0 : i32, i32
  }
  func.func @transform_7(%arg0: i32) -> (i32, i32) {
    %c0_i32 = arith.constant 0 : i32
    %c0_i32_0 = arith.constant 0 : i32
    %c0_i32_1 = arith.constant 0 : i32
    return %c0_i32, %c0_i32_0 : i32, i32
  }
  func.func @transform_8(%arg0: i32) -> (i32, i32) {
    %c0_i32 = arith.constant 0 : i32
    %c0_i32_0 = arith.constant 0 : i32
    return %arg0, %c0_i32 : i32, i32
  }
}

</mosaic_0001>

<bundles_post_ra>
// kernel: encoder_layer.3
= control target key start
LH: loop header
LB: loop body
LE: loop exit
PB: predicated region body
PF: predicated region fallthrough
CT: control target
= control target key end

     0   :  { %v590_v2 = vmov 0   ;;  %s768_s0 = inlined_call_operand.vmem [shape: bf16[16,128], index: 0, kind: input, shape index: {}]   ;;  %s769_s1 = inlined_call_operand.vmem [shape: f32[16,128], index: 1, kind: input, shape index: {}]   ;;  %s770_s2 = inlined_call_operand.vmem [shape: bf16[128,256], index: 2, kind: input, shape index: {}]   ;;  %s771_s3 = inlined_call_operand.vmem [shape: f32[1,256], index: 3, kind: input, shape index: {}]   ;;  %s772_s4 = inlined_call_operand.vmem [shape: bf16[256,128], index: 4, kind: input, shape index: {}]   ;;  %s773_s5 = inlined_call_operand.vmem [shape: f32[1,128], index: 5, kind: input, shape index: {}]   ;;  %s774_s6 = inlined_call_operand.vmem [shape: f32[1,128], index: 6, kind: input, shape index: {}]   ;;  %s775_s7 = inlined_call_operand.vmem [shape: f32[1,128], index: 7, kind: input, shape index: {}]   ;;  %s776_s8 = inlined_call_operand.hbm [shape: f32[16,128], index: 8, kind: output, shape index: {}]  }
   0x1   :  { %v513_v0 = vld [vmem:[%s770_s2 + $0x4] ss:$8 sps:$4 sm:$0xff]   ;;  %v515_v1 = vld [vmem:[%s770_s2] ss:$8 sps:$4 sm:$0xff]   ;;  %179 = vmatprep.mubr.bf16.mxu0 %v590_v2  ;;  %v516_v3 = vld [vmem:[%s770_s2 + $0x14] ss:$8 sps:$4 sm:$0xff]  }
   0x2   :  { %147 = vmatprep.subr.bf16.mxu0 %v513_v0  ;;  %v518_v4 = vld [vmem:[%s770_s2 + $0x10] ss:$8 sps:$4 sm:$0xff]   ;;  %v519_v5 = vld [vmem:[%s770_s2 + $0x24] ss:$8 sps:$4 sm:$0xff]   ;;  %v521_v6 = vld [vmem:[%s770_s2 + $0x20] ss:$8 sps:$4 sm:$0xff]  }
   0x3   :  { %148 = vmatpush1.bf16.msra.mxu0 %v515_v1  ;;  %v522_v7 = vld [vmem:[%s770_s2 + $0x34] ss:$8 sps:$4 sm:$0xff]   ;;  %v524_v8 = vld [vmem:[%s770_s2 + $0x30] ss:$8 sps:$4 sm:$0xff]   ;;  %v525_v9 = vld [vmem:[%s770_s2 + $0x44] ss:$8 sps:$4 sm:$0xff]  }
   0x4   :  { %149 = vmatprep.subr.bf16.mxu0 %v516_v3  ;;  %v538_v10 = vld [vmem:[%s772_s4 + $0x40] sm:$0xff]   ;;  %v540_v13 = vld [vmem:[%s772_s4 + $0x48] sm:$0xff]   ;;  %v528_v14 = vld [vmem:[%s770_s2 + $0x54] ss:$8 sps:$4 sm:$0xff]  }
   0x5   :  { %v527_v11 = vld [vmem:[%s770_s2 + $0x40] ss:$8 sps:$4 sm:$0xff]   ;;  %487 = vmatprep.subr.bf16.mxu1 %v538_v10  ;;  %v530_v16 = vld [vmem:[%s770_s2 + $0x50] ss:$8 sps:$4 sm:$0xff]   ;;  %v531_v17 = vld [vmem:[%s770_s2 + $0x64] ss:$8 sps:$4 sm:$0xff]  }
   0x6   :  { %v539_v12 = vld [vmem:[%s772_s4] sm:$0xff]   ;;  %v541_v15 = vld [vmem:[%s772_s4 + $0x8] sm:$0xff]   ;;  %v534_v19 = vld [vmem:[%s770_s2 + $0x74] ss:$8 sps:$4 sm:$0xff]  }
   0x7   :  { %150 = vmatpush1.bf16.msra.mxu0 %v518_v4  ;;  %488 = vmatpush3.bf16.msra.mxu1 %v539_v12  ;;  %v533_v18 = vld [vmem:[%s770_s2 + $0x60] ss:$8 sps:$4 sm:$0xff]  }
   0x8   :  { %151 = vmatprep.subr.bf16.mxu0 %v519_v5  ;;  %489 = vmatprep.subr.bf16.mxu1 %v540_v13 }
   0xb   :  { %152 = vmatpush1.bf16.msra.mxu0 %v521_v6  ;;  %490 = vmatpush3.bf16.msra.mxu1 %v541_v15 }
   0xc   :  { %153 = vmatprep.subr.bf16.mxu0 %v522_v7 }
   0xf   :  { %154 = vmatpush1.bf16.msra.mxu0 %v524_v8 }
  0x10   :  { %155 = vmatprep.subr.bf16.mxu0 %v525_v9 }
  0x13   :  { %156 = vmatpush1.bf16.msra.mxu0 %v527_v11 }
  0x14   :  { %157 = vmatprep.subr.bf16.mxu0 %v528_v14 }
  0x17   :  { %158 = vmatpush1.bf16.msra.mxu0 %v530_v16 }
  0x18   :  { %159 = vmatprep.subr.bf16.mxu0 %v531_v17 }
  0x19   :  { %13 = vsyncpa [#allocation3], 0  ;;  %v536_v20 = vld [vmem:[%s770_s2 + $0x70] ss:$8 sps:$4 sm:$0xff]   ;;  %v537_v21 = vld [vmem:[%s768_s0] sm:$0xff]   ;;  %v51_v34 = vlaneseq  ;;  %s591_s0 = smov [#allocation2]  }
  0x1a   :  { %v542_v22 = vld [vmem:[%s772_s4 + $0x50] sm:$0xff]   ;;  %v544_v24 = vld [vmem:[%s772_s4 + $0x58] sm:$0xff]   ;;  %v546_v26 = vld [vmem:[%s772_s4 + $0x60] sm:$0xff]   ;;  %s440_s10 = sshll.u32 %s591_s0, 4  ;;  %s441_s10 = int_to_ptr.vmem [resolvable:$true] %s440_s10 }
  0x1b   :  { %160 = vmatpush1.bf16.msra.mxu0 %v533_v18  ;;  %v543_v23 = vld [vmem:[%s772_s4 + $0x10] sm:$0xff]   ;;  %491 = vmatprep.subr.bf16.mxu1 %v542_v22  ;;  %v545_v25 = vld [vmem:[%s772_s4 + $0x18] sm:$0xff]   ;;  %v547_v27 = vld [vmem:[%s772_s4 + $0x20] sm:$0xff]   ;;  %v52_v35 = vshrl.u32 %v51_v34, 7  ;;  %s566_s11 = scalar_lea.vmem %s441_s10, 256  ;;  %p571_p1 = scmp.lt.s32.totalorder %s441_s10, %s441_s10 }
  0x1c   :  { %161 = vmatprep.subr.bf16.mxu0 %v534_v19  ;;  %492 = vmatpush3.bf16.msra.mxu1 %v543_v23  ;;  %v548_v28 = vld [vmem:[%s772_s4 + $0x68] sm:$0xff]   ;;  %v550_v30 = vld [vmem:[%s772_s4 + $0x70] sm:$0xff]   ;;  %v552_v32 = vld [vmem:[%s772_s4 + $0x78] sm:$0xff]   ;;  %p567_p0 = scmp.ne.s32.totalorder %s441_s10, %s566_s11  ;;  %p572_p2 = scmp.lt.s32.totalorder %s566_s11, %s566_s11 }
  0x1d   :  { %493 = vmatprep.subr.bf16.mxu1 %v544_v24  ;;  %v549_v29 = vld [vmem:[%s772_s4 + $0x28] sm:$0xff]   ;;  %v551_v31 = vld [vmem:[%s772_s4 + $0x30] sm:$0xff]   ;;  %v553_v33 = vld [vmem:[%s772_s4 + $0x38] sm:$0xff]   ;;  %v53_v36 = vsub.s32 0, %v52_v35  ;;  %v57_v38 = vsub.s32 1, %v52_v35 }
  0x1e   :  { %v49_v37 = vld [vmem:[%s771_s3] sm:$0x3]  ;;  %v389_v18 = vld [vmem:[%s769_s1 + $0x8] sm:$0xff]  ;;  %p573_p3 = por %p572_p2, %p571_p1 }
  0x1f   :  { %162 = vmatpush1.bf16.msra.mxu0 %v536_v20  ;;  %v54_v39 = vrot.slane %v49_v37, %v53_v36  ;;  %v58_v40 = vrot.slane %v49_v37, %v57_v38  ;;  %v468_v8 = vld [vmem:[%s773_s5] ss:$0 sm:$0xff] }
  0x20   :  { %494 = vmatpush3.bf16.msra.mxu1 %v545_v25  ;;  %v388_v13 = vld [vmem:[%s769_s1] sm:$0xff]  ;;  %p574_p4 = pnand %p573_p3, %p567_p0 }
  0x21   :  { %495 = vmatprep.subr.bf16.mxu1 %v546_v26  ;;  %v485_v35 = vld [vmem:[%s774_s6] ss:$0 sm:$0xff] }
  0x22   :  { %180 = vmatmul.mubr.bf16.vlgmr.msra.gmra.mrb[0].mxu0 %v537_v21  ;;  %v486_v37 = vld [vmem:[%s775_s7] ss:$0 sm:$0xff] }
  0x24   :  { %496 = vmatpush3.bf16.msra.mxu1 %v547_v27 }
  0x25   :  { %497 = vmatprep.subr.bf16.mxu1 %v548_v28 }
  0x28   :  { %498 = vmatpush3.bf16.msra.mxu1 %v549_v29 }
  0x29   :  { %499 = vmatprep.subr.bf16.mxu1 %v550_v30 }
  0x2c   :  { %500 = vmatpush3.bf16.msra.mxu1 %v551_v31 }
  0x2d   :  { %501 = vmatprep.subr.bf16.mxu1 %v552_v32 }
  0x30   :  { %502 = vmatpush3.bf16.msra.mxu1 %v553_v33 }
  0xf5   :  { %v181_v41 = vpop.f32.mrb[0].mxu0 }
  0xf6   :  { %v182_v42 = vadd.f32 %v181_v41, %v54_v39  ;;  %v183_v43 = vpop.f32.mrb[1].mxu0 }
  0xf7   :  { %v184_v44 = vadd.f32 %v183_v43, %v58_v40  ;;  %v185_v45 = vpop.f32.mrb[2].mxu0 }
  0xf8   :  { %v194_v46 = vmul.f32 0.70710677, %v182_v42  ;;  %v186_v47 = vadd.f32 %v185_v45, %v54_v39  ;;  %v187_v48 = vpop.f32.mrb[3].mxu0  ;;  %v190_v59 = vmul.f32 0.5, %v182_v42 }
  0xf9   :  { %v195_v49 = vmul.f32 0.70710677, %v184_v44  ;;  %v188_v50 = vadd.f32 %v187_v48, %v58_v40  ;;  %v191_v62 = vmul.f32 0.5, %v184_v44 }
  0xfa   :  { %554 = verf.f32 %v194_v46  ;;  %v196_v51 = vmul.f32 0.70710677, %v186_v47  ;;  %v192_v60 = vmul.f32 0.5, %v186_v47 }
  0xfb   :  { %556 = verf.f32 %v195_v49  ;;  %v197_v52 = vmul.f32 0.70710677, %v188_v50  ;;  %v193_v63 = vmul.f32 0.5, %v188_v50 }
  0xfc   :  { %558 = verf.f32 %v196_v51 }
  0xfd   :  { %560 = verf.f32 %v197_v52 }
 0x104   :  { %v555_v53 = vpop.eup %554 }
 0x105   :  { %v557_v54 = vpop.eup %556  ;;  %v202_v55 = vadd.f32 1.0, %v555_v53 }
 0x106   :  { %v559_v56 = vpop.eup %558  ;;  %v203_v57 = vadd.f32 1.0, %v557_v54 }
 0x107   :  { %v561_v58 = vpop.eup %560  ;;  %v204_v61 = vadd.f32 1.0, %v559_v56  ;;  %v206_v1 = vmul.f32 %v202_v55, %v190_v59 }
 0x108   :  { %v205_v0 = vadd.f32 1.0, %v561_v58  ;;  %v207_v3 = vmul.f32 %v203_v57, %v191_v62 }
 0x109   :  { %v208_v2 = vmul.f32 %v204_v61, %v192_v60 }
 0x10a   :  { %v209_v4 = vmul.f32 %v205_v0, %v193_v63 }
 0x10b   :  { %v210_v5 = vpack.c.bf16 %v208_v2, %v206_v1 }
 0x10c   :  { %v211_v6 = vpack.c.bf16 %v209_v4, %v207_v3 }
 0x10e   :  { %379 = vmatprep.mubr.bf16.mxu1 %v211_v6 }
 0x10f   :  { %380 = vmatmul.mubr.bf16.vlgmr.msra.gmra.mrb[0].mxu1 %v210_v5 }
 0x1e2   :  { %v503_v7 = vpop.f32.mrb[0].mxu1 }
 0x1e3   :  { %v504_v9 = vpop.f32.mrb[1].mxu1 }
 0x1e4   :  { %v505_v10 = vadd.f32 %v504_v9, %v503_v7  ;;  %v506_v11 = vpop.f32.mrb[2].mxu1 }
 0x1e5   :  { %v507_v12 = vpop.f32.mrb[3].mxu1 }
 0x1e6   :  { %v382_v14 = vadd.f32 %v505_v10, %v468_v8  ;;  %v508_v15 = vadd.f32 %v507_v12, %v506_v11 }
 0x1e8   :  { %v385_v16 = vadd.f32 %v508_v15, %v468_v8  ;;  %v390_v17 = vadd.f32 %v388_v13, %v382_v14 }
 0x1ea   :  { %394 = vadd.xlane.f32.xlu0 %v390_v17  ;;  %v391_v19 = vadd.f32 %v389_v18, %v385_v16 }
 0x1ee   :  { %396 = vadd.xlane.f32.xlu0 %v391_v19 }
 0x277   :  { %v395_v20 = vpop.xlane.xlu0 %394 }
 0x278   :  { %v399_v21 = vmul.f32 0.0078125, %v395_v20 }
 0x27a   :  { %v401_v22 = vsub.f32 %v390_v17, %v399_v21 }
 0x27b   :  { %v397_v23 = vpop.xlane.xlu0 %396 }
 0x27c   :  { %v400_v24 = vmul.f32 0.0078125, %v397_v23  ;;  %v403_v25 = vmul.f32 %v401_v22, %v401_v22 }
 0x27e   :  { %v402_v26 = vsub.f32 %v391_v19, %v400_v24  ;;  %405 = vadd.xlane.f32.xlu1 %v403_v25 }
 0x280   :  { %v404_v27 = vmul.f32 %v402_v26, %v402_v26 }
 0x282   :  { %407 = vadd.xlane.f32.xlu1 %v404_v27 }
 0x30b   :  { %v406_v28 = vpop.xlane.xlu1 %405 }
 0x30c   :  { %v409_v29 = vmul.f32 0.0078125, %v406_v28 }
 0x30e   :  { %v411_v30 = vadd.f32 1e-05, %v409_v29 }
 0x30f   :  { %v408_v31 = vpop.xlane.xlu1 %407 }
 0x310   :  { %562 = vrsqrt.f32 %v411_v30  ;;  %v410_v32 = vmul.f32 0.0078125, %v408_v31 }
 0x312   :  { %v412_v33 = vadd.f32 1e-05, %v410_v32 }
 0x314   :  { %564 = vrsqrt.f32 %v412_v33 }
 0x31a   :  { %v563_v34 = vpop.eup %562 }
 0x31b   :  { %v415_v36 = vmul.f32 %v563_v34, %v401_v22 }
 0x31d   :  { %v423_v38 = vmul.f32 %v485_v35, %v415_v36 }
 0x31e   :  { %v565_v39 = vpop.eup %564 }
 0x31f   :  { %v416_v40 = vmul.f32 %v565_v39, %v402_v26  ;;  %v431_v41 = vadd.f32 %v486_v37, %v423_v38 }
 0x321   :  { %v424_v42 = vmul.f32 %v485_v35, %v416_v40  ;;  %433 = vst [vmem:[#allocation2] sm:$0xff] %v431_v41 }
 0x323   :  { %v432_v43 = vadd.f32 %v486_v37, %v424_v42 }
 0x325   :  { %434 = vst [vmem:[#allocation2 + $0x8] sm:$0xff] %v432_v43 }
 0x326   :  { %577 = shalt.err (!%p574_p4)
}
 0x327   :  { %s578_s12 = scalar_lea.hbm %s776_s8, 256 }
 0x328   :  { %p579_p5 = scmp.ne.s32.totalorder %s776_s8, %s578_s12  ;;  %p582_p6 = scmp.lt.u32.totalorder %s578_s12, %s776_s8 }
 0x32a   :  { %p584_p7 = pnand %p582_p6, %p579_p5 }
 0x32c   :  { %587 = shalt.err (!%p584_p7)
}
 0x32d   :  { %s592_s17 = smov 128   ;;  %s593_s18 = smov 8  }
 0x32e   :  { %446 = dma.vmem_to_hbm [thread:$0]  %s441_s10, 256, %s776_s8, [#allocation3], %s592_s17, %s592_s17, %s593_s18  }
 0x32f   :  { %588 = dma.done.wait [#allocation3], 256  }
 0x330   :  { %589 = vsyncadd [#allocation3], 4294967040 }
 0x331   :  { %450 = vsyncpa [#allocation3], 1 }

// kernel: encoder_layer.2
= control target key start
LH: loop header
LB: loop body
LE: loop exit
PB: predicated region body
PF: predicated region fallthrough
CT: control target
= control target key end

     0   :  { %14 = vsyncpa [#allocation4], 0  ;;  %s1648_s27 = smov 0   ;;  %s1843_s0 = inlined_call_operand.vmem [shape: f32[8,256], index: 0, kind: input, shape index: {}]   ;;  %s1844_s1 = inlined_call_operand.hbm [shape: bf16[128,384], index: 1, kind: input, shape index: {}]   ;;  %s1845_s2 = inlined_call_operand.vmem [shape: f32[1,384], index: 2, kind: input, shape index: {}]   ;;  %s1846_s3 = inlined_call_operand.vmem [shape: bf16[128,128], index: 3, kind: input, shape index: {}]   ;;  %s1847_s4 = inlined_call_operand.vmem [shape: f32[1,128], index: 4, kind: input, shape index: {}]   ;;  %s1848_s5 = inlined_call_operand.vmem [shape: f32[1,128], index: 5, kind: input, shape index: {}]   ;;  %s1849_s6 = inlined_call_operand.vmem [shape: f32[1,128], index: 6, kind: input, shape index: {}]   ;;  %s1850_s7 = inlined_call_operand.vmem [shape: f32[8,256], index: 7, kind: output, shape index: {0}]   ;;  %s1851_s8 = inlined_call_operand.vmem [shape: bf16[8,256], index: 8, kind: output, shape index: {1}]  }
   0x1 LB: > { %s1654_s28 = sadd.s32 4294967295, %s1592_s27   ;;  %p1294_p0 = scmp.ge.s32.totalorder %s1592_s27, 1  ;;  %s1592_s27 = sphi %s1648_s27, %s20_s27  }
   0x2   : > { %p229_p1 = scmp.lt.s32.totalorder %s1592_s27, 3  ;;  %s1594_s29 = smov [#allocation3]  }
   0x3   : > { %s241_s30 = sshll.u32 %s1594_s29, 4  ;;  %p1852_p3 = scmp.eq.s32.totalorder %s1654_s28, 0  ;;  %s242_s30 = int_to_ptr.vmem [resolvable:$true] %s241_s30 }
   0x4   : > { %p1658_p2 = pnand %p1294_p0, %p229_p1  ;;  %s1554_s13 = scalar_lea.hbm %s1844_s1, 3072 }
   0x5   : > { %p1555_p6 = scmp.ne.s32.totalorder %s1844_s1, %s1554_s13  ;;  %p1561_p10 = scmp.lt.u32.totalorder %s1554_s13, %s1844_s1 }
   0x6   : > { %s1854_s9 = scalar_select %p1658_p2, 1, 0 }
   0x7   : > { %p1473_p4 = pneg %p1658_p2 }
   0x9   : > { %p1667_p5 = pnand %p1852_p3, %p1473_p4 }
   0xb   : > { %p1556_p7 = pneg %p1667_p5 }
   0xd   : > { %p1557_p8 = pnand %p1556_p7, %p1555_p6 }
   0xf   : > { %p1558_p9 = pneg %p1557_p8 }
  0x11   : > { %p1563_p11 = pnand %p1561_p10, %p1558_p9 }
  0x13   : > { %1566 = shalt.err (!%p1563_p11)
}
  0x14   : > { %s1567_s18 = scalar_lea.vmem %s242_s30, 3072  ;;  %p1575_p1 = scmp.lt.s32.totalorder %s242_s30, %s242_s30 }
  0x15   : > { %p1568_p12 = scmp.ne.s32.totalorder %s242_s30, %s1567_s18  ;;  %p1576_p4 = scmp.lt.s32.totalorder %s1567_s18, %s1567_s18 }
  0x17   : > { %p1570_p13 = pnand %p1568_p12, %p1556_p7  ;;  %p1577_p3 = por %p1576_p4, %p1575_p1 }
  0x19   : > { %p1571_p0 = pneg %p1570_p13 }
  0x1b   : > { %p1578_p2 = pnand %p1577_p3, %p1571_p0 }
  0x1d   : > { %1581 = shalt.err (!%p1578_p2)
}
  0x1e   : > { %s1595_s19 = smov 192   ;;  %s1596_s20 = smov 12  }
  0x1f   : > { %1476 = dma.hbm_to_vmem [thread:$0]  (!%p1667_p5), %s1844_s1, 3072, %s242_s30, [#allocation4], %s1595_s19, %s1595_s19, %s1596_s20  }
  0x20   : > { %p1856_p6 = scmp.ne.s32.totalorder %s1854_s9, 0 }
  0x21   : > { %p1857_p8 = scmp.eq.s32.totalorder (!%p1856_p6), %s1654_s28, 0 }
  0x22   : > { %279 = sbr.rel (%p1856_p6) target bundleno = 1938 (0x792), region = 48 }
  0x29   : > { %1587 = dma.done.wait (%p1857_p8), [#allocation4], 3072   ;;  %p1858_p7 = pmov %p1857_p8 }
  0x2a   : > { %v1597_v0 = vmov 0   ;;  %v1598_v1 = vmov 0.0   ;;  %v1496_v2 = vld [vmem:[#allocation3 + $0x4] ss:$12 sps:$4 sm:$0xff]   ;;  %v1498_v3 = vld [vmem:[#allocation3] ss:$12 sps:$4 sm:$0xff]   ;;  %v364_v28 = vlaneseq }
  0x2b   : > { %1589 = vsyncadd (%p1858_p7), [#allocation4], 4294964224  ;;  %539 = vmatprep.mubr.bf16.mxu0 %v1597_v0  ;;  %1381 = vmatprep.subr.bf16.mxu1 %v1598_v1  ;;  %v1499_v4 = vld [vmem:[#allocation3 + $0x1c] ss:$12 sps:$4 sm:$0xff]   ;;  %v1501_v5 = vld [vmem:[#allocation3 + $0x18] ss:$12 sps:$4 sm:$0xff]  }
  0x2c   : > { %507 = vmatprep.subr.bf16.mxu0 %v1496_v2  ;;  %v1502_v6 = vld [vmem:[#allocation3 + $0x34] ss:$12 sps:$4 sm:$0xff]   ;;  %p315_p2 = scmp.lt.s32.totalorder %s1654_s28, 1  ;;  %v1504_v7 = vld [vmem:[#allocation3 + $0x30] ss:$12 sps:$4 sm:$0xff]   ;;  %vm1599_vm0 = vmmov 0  }
  0x2d   : > { %508 = vmatpush1.bf16.msra.mxu0 %v1498_v3  ;;  %v1505_v8 = vld [vmem:[#allocation3 + $0x4c] ss:$12 sps:$4 sm:$0xff]   ;;  %v1507_v9 = vld [vmem:[#allocation3 + $0x48] ss:$12 sps:$4 sm:$0xff]   ;;  %v1508_v11 = vld [vmem:[#allocation3 + $0x64] ss:$12 sps:$4 sm:$0xff]   ;;  %1397 = vmatprep.mubr.msk.bf16.mxu1 %vm1599_vm0, %v1598_v1 }
  0x2e   : > { %509 = vmatprep.subr.bf16.mxu0 %v1499_v4  ;;  %s1860_s28 = smov (!%p315_p2, %s1654_s28), 1  ;;  %v1520_v10 = vld [vmem:[#allocation3 + $0x8] ss:$12 sps:$4 sm:$0xff]   ;;  %v1521_v12 = vld [vmem:[#allocation3 + $0x20] ss:$12 sps:$4 sm:$0xff]   ;;  %v365_v29 = vshrl.u32 %v364_v28, 7 }
  0x2f   : > { %1382 = vmatpush3.bf16.msra.mxu1 %v1520_v10  ;;  %s1299_s23 = sshll.u32 %s1860_s28, 3  ;;  %v1510_v13 = vld [vmem:[#allocation3 + $0x60] ss:$12 sps:$4 sm:$0xff]   ;;  %v1511_v14 = vld [vmem:[#allocation3 + $0x7c] ss:$12 sps:$4 sm:$0xff]   ;;  %vm592_vm1 = vcmask 261120  }
  0x30   : > { %1383 = vmatprep.subr.bf16.mxu1 %v1598_v1  ;;  %v1513_v15 = vld [vmem:[#allocation3 + $0x78] ss:$12 sps:$4 sm:$0xff]   ;;  %v1514_v17 = vld [vmem:[#allocation3 + $0x94] ss:$12 sps:$4 sm:$0xff]   ;;  %v1523_v18 = vld [vmem:[#allocation3 + $0x50] ss:$12 sps:$4 sm:$0xff]   ;;  %s318_s26 = scalar_lea.vmem %s1843_s0, %s1299_s23  ;;  %s322_s13 = scalar_lea.vmem %s1850_s7, %s1299_s23 }
  0x31   : > { %510 = vmatpush1.bf16.msra.mxu0 %v1501_v5  ;;  %v1522_v16 = vld [vmem:[#allocation3 + $0x38] ss:$12 sps:$4 sm:$0xff]   ;;  %v1516_v19 = vld [vmem:[#allocation3 + $0x90] ss:$12 sps:$4 sm:$0xff]   ;;  %v1524_v21 = vld [vmem:[#allocation3 + $0x68] ss:$12 sps:$4 sm:$0xff]  }
  0x32   : > { %511 = vmatprep.subr.bf16.mxu0 %v1502_v6  ;;  %v1517_v20 = vld [vmem:[#allocation3 + $0xac] ss:$12 sps:$4 sm:$0xff]   ;;  %v1519_v22 = vld [vmem:[#allocation3 + $0xa8] ss:$12 sps:$4 sm:$0xff]   ;;  %v1527_v27 = vld [vmem:[#allocation3 + $0xb0] ss:$12 sps:$4 sm:$0xff]  }
  0x33   : > { %1384 = vmatpush3.bf16.msra.mxu1 %v1521_v12  ;;  %v1708_v23 = vld [vmem:[%s318_s26] sm:$0xff]  ;;  %v1525_v24 = vld [vmem:[#allocation3 + $0x80] ss:$12 sps:$4 sm:$0xff]   ;;  %v366_v30 = vsub.s32 0, %v365_v29  ;;  %v370_v32 = vsub.s32 1, %v365_v29  ;;  %s1600_s9 = smov 96  }
  0x34   : > { %1385 = vmatprep.subr.bf16.mxu1 %v1598_v1  ;;  %v329_v25 = vpack.c.bf16 %v1708_v23, %v1708_v23  ;;  %v1526_v26 = vld [vmem:[#allocation3 + $0x98] ss:$12 sps:$4 sm:$0xff]   ;;  %s1601_s10 = smov 64   ;;  %s1602_s11 = smov 32   ;;  %v374_v45 = vsub.s32 2, %v365_v29  ;;  %vm653_vm2 = vcmask 1043456  }
  0x35   : > { %512 = vmatpush1.bf16.msra.mxu0 %v1504_v7  ;;  %v362_v31 = vld [vmem:[%s1845_s2] sm:$0x7]  ;;  %vm639_vm3 = vcmask 64512   ;;  %vm817_vm4 = vcmask 523520   ;;  %vm933_vm5 = vcmask 785920   ;;  %vm1049_vm6 = vcmask 1048320  }
  0x36   : > { %513 = vmatprep.subr.bf16.mxu0 %v1505_v8  ;;  %v367_v33 = vrot.slane %v362_v31, %v366_v30  ;;  %v371_v34 = vrot.slane %v362_v31, %v370_v32  ;;  %v375_v46 = vrot.slane %v362_v31, %v374_v45  ;;  %s1301_s17 = sshll.u32 %s1860_s28, 2 }
  0x37   : > { %1386 = vmatpush3.bf16.msra.mxu1 %v1522_v16  ;;  %s326_s20 = scalar_lea.vmem %s1851_s8, %s1301_s17 }
  0x38   : > { %1387 = vmatprep.subr.bf16.mxu1 %v1598_v1 }
  0x39   : > { %514 = vmatpush1.bf16.msra.mxu0 %v1507_v9 }
  0x3a   : > { %515 = vmatprep.subr.bf16.mxu0 %v1508_v11 }
  0x3b   : > { %1388 = vmatpush3.bf16.msra.mxu1 %v1523_v18 }
  0x3c   : > { %1389 = vmatprep.subr.bf16.mxu1 %v1598_v1 }
  0x3d   : > { %516 = vmatpush1.bf16.msra.mxu0 %v1510_v13 }
  0x3e   : > { %517 = vmatprep.subr.bf16.mxu0 %v1511_v14 }
  0x3f   : > { %1390 = vmatpush3.bf16.msra.mxu1 %v1524_v21 }
  0x40   : > { %1391 = vmatprep.subr.bf16.mxu1 %v1598_v1 }
  0x41   : > { %518 = vmatpush1.bf16.msra.mxu0 %v1513_v15 }
  0x42   : > { %519 = vmatprep.subr.bf16.mxu0 %v1514_v17 }
  0x43   : > { %1392 = vmatpush3.bf16.msra.mxu1 %v1525_v24 }
  0x44   : > { %1393 = vmatprep.subr.bf16.mxu1 %v1598_v1 }
  0x45   : > { %520 = vmatpush1.bf16.msra.mxu0 %v1516_v19 }
  0x46   : > { %521 = vmatprep.subr.bf16.mxu0 %v1517_v20 }
  0x47   : > { %1394 = vmatpush3.bf16.msra.mxu1 %v1526_v26 }
  0x48   : > { %1395 = vmatprep.subr.bf16.mxu1 %v1598_v1 }
  0x49   : > { %522 = vmatpush1.bf16.msra.mxu0 %v1519_v22 }
  0x4a   : > { %1425 = vmatprep.subr.bf16.mxu0 %v1598_v1 }
  0x4b   : > { %1396 = vmatpush3.bf16.msra.mxu1 %v1527_v27 }
  0x4c   : > { %540 = vmatmul.mubr.bf16.vlgmr.msra.gmra.mrb[0].mxu0 %v329_v25  ;;  %1401 = vmatprep.subr.bf16.mxu1 %v1598_v1 }
  0x4d   : > { %1427 = vmatprep.mubr.msk.bf16.mxu0 %vm1599_vm0, %v1598_v1 }
  0x4e   : > { %1398 = vmatmul.mubr.bf16.vlgmr.msra.gmra.mrb[0].mxu1 %v329_v25 }
  0x4f   : > { %1403 = vmatprep.mubr.msk.bf16.mxu1 %vm1599_vm0, %v1598_v1 }
 0x11f   : > { %v541_v35 = vpop.f32.mrb[0].mxu0 }
 0x120   : > { %v542_v36 = vadd.f32 %v541_v35, %v367_v33  ;;  %v543_v37 = vpop.f32.mrb[1].mxu0 }
 0x121   : > { %v544_v38 = vadd.f32 %v543_v37, %v371_v34  ;;  %v545_v39 = vpop.f32.mrb[2].mxu0  ;;  %v582_v47 = vpop.f32.mrb[0].mxu1 }
 0x122   : > { %v588_v40 = vmul.f32 0.17677669, %v542_v36  ;;  %v546_v41 = vpop.f32.mrb[3].mxu0  ;;  %v583_v48 = vadd.f32 %v582_v47, %v375_v46  ;;  %v1399_v49 = vpop.f32.mrb[1].mxu1 }
 0x123   : > { %v590_v42 = vpack.c.bf16 %v544_v38, %v544_v38  ;;  %v585_v50 = vpop.f32.mrb[2].mxu1 }
 0x124   : > { %v589_v43 = vpack.c.bf16 %v588_v40, %v588_v40  ;;  %v1736_v51 = vpack.c.bf16 %v583_v48, %v583_v48  ;;  %v1400_v52 = vpop.f32.mrb[3].mxu1 }
 0x125   : > { %v597_v44 = vsel %vm592_vm1, %v590_v42, 0 }
 0x126   : > { %1402 = vmatpush3.bf16.xpose.msra.mxu1 %v597_v44  ;;  %701 = vrot.lane.b32.xlu1 %v589_v43, %s1600_s9  ;;  %v655_v53 = vsel %vm653_vm2, %v1736_v51, 0 }
 0x127   : > { %1407 = vmatprep.subr.bf16.mxu1 %v1598_v1 }
 0x12a   : > { %821 = vrot.lane.b32.xlu1 %v590_v42, %s1601_s10 }
 0x12d   : > { %1404 = vmatmul.mubr.msk.bf16.vlgmr.msra.gmra.mrb[4].mxu1 %vm592_vm1, %v589_v43 }
 0x12e   : > { %819 = vrot.lane.b32.xlu1 %v589_v43, %s1601_s10  ;;  %1409 = vmatprep.mubr.msk.bf16.mxu1 %vm1599_vm0, %v1598_v1 }
 0x12f   : > { %1408 = vmatpush3.bf16.msra.mxu1 %v655_v53 }
 0x130   : > { %1413 = vmatprep.subr.bf16.mxu1 %v1598_v1 }
 0x132   : > { %937 = vrot.lane.b32.xlu1 %v590_v42, %s1602_s11 }
 0x136   : > { %935 = vrot.lane.b32.xlu1 %v589_v43, %s1602_s11 }
 0x198   : > { %v702_v54 = vpop.permute.xlu1 %701 }
 0x19c   : > { %v822_v55 = vpop.permute.xlu1 %821 }
 0x19d   : > { %v827_v56 = vsel %vm592_vm1, %v822_v55, 0  ;;  %v1528_v55 = vld [vmem:[%s1846_s3] sm:$0xff]  }
 0x19e   : > { %1426 = vmatpush3.bf16.xpose.msra.mxu0 %v827_v56  ;;  %v1529_v56 = vld [vmem:[%s1846_s3 + $0x8] sm:$0xff]  }
 0x19f   : > { %1437 = vmatprep.subr.bf16.mxu0 %v1598_v1 }
 0x1a0   : > { %v820_v57 = vpop.permute.xlu1 %819 }
 0x1a4   : > { %v938_v58 = vpop.permute.xlu1 %937 }
 0x1a5   : > { %v943_v59 = vsel %vm592_vm1, %v938_v58, 0  ;;  %1428 = vmatmul.mubr.msk.bf16.vlgmr.msra.gmra.mrb[4].mxu0 %vm592_vm1, %v820_v57 }
 0x1a6   : > { %1438 = vmatpush3.bf16.xpose.msra.mxu0 %v943_v59  ;;  %1439 = vmatprep.mubr.msk.bf16.mxu0 %vm1599_vm0, %v1598_v1 }
 0x1a7   : > { %1449 = vmatprep.subr.bf16.mxu0 %v1598_v1 }
 0x1a8   : > { %v936_v60 = vpop.permute.xlu1 %935 }
 0x1ad   : > { %1440 = vmatmul.mubr.msk.bf16.vlgmr.msra.gmra.mrb[8].mxu0 %vm592_vm1, %v936_v60 }
 0x1ae   : > { %1465 = vmatprep.mubr.msk.bf16.mxu0 %vm1599_vm0, %v1598_v1  ;;  %1450 = vmatpush3.bf16.msra.mxu0 %v1528_v55 }
 0x1af   : > { %1451 = vmatprep.subr.bf16.mxu0 %v1598_v1 }
 0x1b2   : > { %1452 = vmatpush3.bf16.msra.mxu0 %v1529_v56 }
 0x1b3   : > { %1453 = vmatprep.subr.bf16.mxu0 %v1598_v1 }
 0x200   : > { %v633_v61 = vpop.f32.mrb[4].mxu1 }
 0x201   : > { %v1405_v62 = vpop.f32.mrb[5].mxu1  ;;  %v640_v63 = vsel %vm639_vm3, %v633_v61, -inf }
 0x202   : > { %641 = vmax.xlane.f32.xlu0 %v640_v63  ;;  %v636_v0 = vpop.f32.mrb[6].mxu1  ;;  %v1530_v62 = vld [vmem:[%s1846_s3 + $0x10] sm:$0xff]   ;;  %v1531_v63 = vld [vmem:[%s1846_s3 + $0x18] sm:$0xff]  }
 0x203   : > { %v1406_v2 = vpop.f32.mrb[7].mxu1  ;;  %1454 = vmatpush3.bf16.msra.mxu0 %v1530_v62 }
 0x204   : > { %1455 = vmatprep.subr.bf16.mxu0 %v1598_v1  ;;  %v1532_v2 = vld [vmem:[%s1846_s3 + $0x20] sm:$0xff]  }
 0x207   : > { %1456 = vmatpush3.bf16.msra.mxu0 %v1531_v63 }
 0x208   : > { %1457 = vmatprep.subr.bf16.mxu0 %v1598_v1 }
 0x20b   : > { %1458 = vmatpush3.bf16.msra.mxu0 %v1532_v2 }
 0x20c   : > { %1459 = vmatprep.subr.bf16.mxu0 %v1598_v1 }
 0x218   : > { %704 = vrot.lane.b32.xlu0 %v590_v42, %s1600_s9 }
 0x278   : > { %v863_v3 = vpop.f32.mrb[4].mxu0 }
 0x279   : > { %v1429_v4 = vpop.f32.mrb[5].mxu0  ;;  %v869_v5 = vsel %vm639_vm3, %v863_v3, -inf }
 0x27a   : > { %v866_v6 = vpop.f32.mrb[6].mxu0  ;;  %870 = vmax.xlane.f32.xlu0 %v869_v5  ;;  %v1533_v5 = vld [vmem:[%s1846_s3 + $0x28] sm:$0xff]  }
 0x27b   : > { %v1430_v7 = vpop.f32.mrb[7].mxu0  ;;  %1460 = vmatpush3.bf16.msra.mxu0 %v1533_v5 }
 0x27c   : > { %1461 = vmatprep.subr.bf16.mxu0 %v1598_v1 }
 0x280   : > { %v979_v8 = vpop.f32.mrb[8].mxu0 }
 0x281   : > { %v1441_v9 = vpop.f32.mrb[9].mxu0  ;;  %v985_v10 = vsel %vm639_vm3, %v979_v8, -inf }
 0x282   : > { %986 = vmax.xlane.f32.xlu1 %v985_v10  ;;  %v982_v11 = vpop.f32.mrb[10].mxu0  ;;  %v1534_v10 = vld [vmem:[%s1846_s3 + $0x30] sm:$0xff]  }
 0x283   : > { %v1442_v12 = vpop.f32.mrb[11].mxu0  ;;  %1462 = vmatpush3.bf16.msra.mxu0 %v1534_v10 }
 0x284   : > { %1463 = vmatprep.subr.bf16.mxu0 %v1598_v1 }
 0x28f   : > { %v642_v13 = vpop.xlane.xlu0 %641 }
 0x290   : > { %v643_v14 = vsub.f32 %v633_v61, %v642_v13  ;;  %763 = vrot.lane.b32.xlu0 %v1736_v51, %s1600_s9  ;;  %v1535_v13 = vld [vmem:[%s1846_s3 + $0x38] sm:$0xff]  }
 0x291   : > { %1464 = vmatpush3.bf16.msra.mxu0 %v1535_v13 }
 0x292   : > { %v644_v15 = vmul.f32 1.442695, %v643_v14 }
 0x293   : > { %v705_v17 = vpop.permute.xlu0 %704 }
 0x294   : > { %1536 = vpow2.f32 %v644_v15  ;;  %v710_v19 = vsel %vm592_vm1, %v705_v17, 0 }
 0x29e   : > { %v1537_v16 = vpop.eup %1536 }
 0x29f   : > { %v649_v18 = vpack.c.bf16 %v1537_v16, %v1537_v16 }
 0x2a1   : > { %1410 = vmatmul.mubr.msk.bf16.vlgmr.msra.gmra.mrb[8].mxu1 %vm639_vm3, %v649_v18 }
 0x2a2   : > { %1414 = vmatpush3.bf16.xpose.msra.mxu1 %v710_v19  ;;  %1415 = vmatprep.mubr.msk.bf16.mxu1 %vm1599_vm0, %v1598_v1 }
 0x2a3   : > { %1419 = vmatprep.subr.bf16.mxu1 %v1598_v1 }
 0x2a9   : > { %1416 = vmatmul.mubr.msk.bf16.vlgmr.msra.gmra.mrb[12].mxu1 %vm592_vm1, %v702_v54 }
 0x2aa   : > { %1421 = vmatprep.mubr.msk.bf16.mxu1 %vm1599_vm0, %v1598_v1 }
 0x307   : > { %v871_v20 = vpop.xlane.xlu0 %870 }
 0x308   : > { %v872_v21 = vsub.f32 %v863_v3, %v871_v20 }
 0x30a   : > { %v873_v34 = vmul.f32 1.442695, %v872_v21 }
 0x30b   : > { %v764_v22 = vpop.permute.xlu0 %763 }
 0x30c   : > { %v769_v24 = vsel %vm653_vm2, %v764_v22, 0  ;;  %1538 = vpow2.f32 %v873_v34 }
 0x30d   : > { %1420 = vmatpush3.bf16.msra.mxu1 %v769_v24 }
 0x30e   : > { %1431 = vmatprep.subr.bf16.mxu1 %v1598_v1 }
 0x30f   : > { %v987_v37 = vpop.xlane.xlu1 %986 }
 0x310   : > { %v988_v38 = vsub.f32 %v979_v8, %v987_v37 }
 0x312   : > { %v989_v41 = vmul.f32 1.442695, %v988_v38 }
 0x316   : > { %v1539_v35 = vpop.eup %1538 }
 0x317   : > { %v875_v36 = vsel %vm639_vm3, %v1539_v35, 0.0  ;;  %v878_v52 = vpack.c.bf16 %v1539_v35, %v1539_v35 }
 0x374   : > { %v691_v25 = vpop.f32.mrb[8].mxu1 }
 0x375   : > { %v1411_v26 = vpop.f32.mrb[9].mxu1 }
 0x376   : > { %v694_v27 = vpop.f32.mrb[10].mxu1 }
 0x377   : > { %v1412_v28 = vpop.f32.mrb[11].mxu1 }
 0x37c   : > { %v746_v29 = vpop.f32.mrb[12].mxu1 }
 0x37d   : > { %v1417_v30 = vpop.f32.mrb[13].mxu1  ;;  %v752_v31 = vsel %vm639_vm3, %v746_v29, -inf }
 0x37e   : > { %753 = vmax.xlane.f32.xlu1 %v752_v31  ;;  %v749_v32 = vpop.f32.mrb[14].mxu1 }
 0x37f   : > { %v1418_v33 = vpop.f32.mrb[15].mxu1 }
 0x38f   : > { %879 = vrot.lane.b32.xlu1 %v1736_v51, %s1601_s10 }
 0x393   : > { %995 = vrot.lane.b32.xlu1 %v1736_v51, %s1602_s11  ;;  %v646_v51 = vsel %vm639_vm3, %v1537_v16, 0.0 }
 0x3b7   : > { %876 = vadd.xlane.f32.xlu1 %v875_v36 }
 0x40b   : > { %v754_v39 = vpop.xlane.xlu1 %753 }
 0x40c   : > { %v755_v40 = vsub.f32 %v746_v29, %v754_v39  ;;  %v1334_v29 = vld [vmem:[%s1847_s4] ss:$0 sm:$0xff] }
 0x40e   : > { %v756_v42 = vmul.f32 1.442695, %v755_v40 }
 0x40f   : > { %v880_v44 = vpop.permute.xlu1 %879 }
 0x410   : > { %1540 = vpow2.f32 %v756_v42  ;;  %v885_v48 = vsel %vm653_vm2, %v880_v44, 0  ;;  %v1343_v44 = vld [vmem:[%s1848_s5] ss:$0 sm:$0xff] }
 0x411   : > { %1542 = vpow2.f32 %v989_v41 }
 0x413   : > { %v996_v50 = vpop.permute.xlu1 %995 }
 0x414   : > { %v1001_v53 = vsel %vm653_vm2, %v996_v50, 0 }
 0x41a   : > { %v1541_v43 = vpop.eup %1540 }
 0x41b   : > { %v758_v45 = vsel %vm639_vm3, %v1541_v43, 0.0  ;;  %v761_v46 = vpack.c.bf16 %v1541_v43, %v1541_v43  ;;  %v1543_v47 = vpop.eup %1542 }
 0x41c   : > { %759 = vadd.xlane.f32.xlu0 %v758_v45  ;;  %v991_v49 = vsel %vm639_vm3, %v1543_v47, 0.0  ;;  %v994_v54 = vpack.c.bf16 %v1543_v47, %v1543_v47 }
 0x41d   : > { %1422 = vmatmul.mubr.msk.bf16.vlgmr.msra.gmra.mrb[16].mxu1 %vm639_vm3, %v761_v46 }
 0x41e   : > { %1432 = vmatpush3.bf16.msra.mxu1 %v885_v48  ;;  %1433 = vmatprep.mubr.msk.bf16.mxu1 %vm1599_vm0, %v1598_v1 }
 0x41f   : > { %1443 = vmatprep.subr.bf16.mxu1 %v1598_v1 }
 0x420   : > { %992 = vadd.xlane.f32.xlu0 %v991_v49 }
 0x424   : > { %647 = vadd.xlane.f32.xlu0 %v646_v51 }
 0x425   : > { %1434 = vmatmul.mubr.msk.bf16.vlgmr.msra.gmra.mrb[20].mxu1 %vm639_vm3, %v878_v52 }
 0x426   : > { %1444 = vmatpush3.bf16.msra.mxu1 %v1001_v53  ;;  %1445 = vmatprep.mubr.msk.bf16.mxu1 %vm1599_vm0, %v1598_v1 }
 0x42d   : > { %1446 = vmatmul.mubr.msk.bf16.vlgmr.msra.gmra.mrb[24].mxu1 %vm639_vm3, %v994_v54 }
 0x444   : > { %v877_v0 = vpop.xlane.xlu1 %876 }
 0x4a9   : > { %v760_v57 = vpop.xlane.xlu0 %759 }
 0x4ad   : > { %v993_v58 = vpop.xlane.xlu0 %992 }
 0x4b1   : > { %v648_v59 = vpop.xlane.xlu0 %647 }
 0x4b2   : > { %1544 = vrcp.f32 %v648_v59 }
 0x4b3   : > { %1546 = vrcp.f32 %v760_v57 }
 0x4b4   : > { %1548 = vrcp.f32 %v877_v0 }
 0x4b5   : > { %1550 = vrcp.f32 %v993_v58 }
 0x4bc   : > { %v1545_v60 = vpop.eup %1544 }
 0x4bd   : > { %v698_v61 = vmul.f32 %v1545_v60, %v691_v25  ;;  %v1547_v3 = vpop.eup %1546 }
 0x4be   : > { %v1549_v11 = vpop.eup %1548 }
 0x4bf   : > { %699 = vst.msk [vmem:[#allocation2] sm:$0xff] %vm592_vm1, %v698_v61  ;;  %v1551_v18 = vpop.eup %1550 }
 0x4f0   : > { %v805_v4 = vpop.f32.mrb[16].mxu1 }
 0x4f1   : > { %v812_v6 = vmul.f32 %v1547_v3, %v805_v4  ;;  %v1423_v7 = vpop.f32.mrb[17].mxu1 }
 0x4f2   : > { %v808_v8 = vpop.f32.mrb[18].mxu1 }
 0x4f3   : > { %814 = vrot.lane.b32.xlu1 %v812_v6, %s1602_s11  ;;  %v1424_v9 = vpop.f32.mrb[19].mxu1 }
 0x4f8   : > { %v921_v12 = vpop.f32.mrb[20].mxu1 }
 0x4f9   : > { %v928_v14 = vmul.f32 %v1549_v11, %v921_v12  ;;  %v1435_v15 = vpop.f32.mrb[21].mxu1 }
 0x4fa   : > { %v924_v16 = vpop.f32.mrb[22].mxu1 }
 0x4fb   : > { %930 = vrot.lane.b32.xlu0 %v928_v14, %s1601_s10  ;;  %v1436_v17 = vpop.f32.mrb[23].mxu1 }
 0x500   : > { %v1037_v19 = vpop.f32.mrb[24].mxu1 }
 0x501   : > { %v1044_v20 = vmul.f32 %v1551_v18, %v1037_v19  ;;  %v1447_v21 = vpop.f32.mrb[25].mxu1 }
 0x502   : > { %v1040_v22 = vpop.f32.mrb[26].mxu1 }
 0x503   : > { %1046 = vrot.lane.b32.xlu1 %v1044_v20, %s1600_s9  ;;  %v1448_v24 = vpop.f32.mrb[27].mxu1 }
 0x565   : > { %v815_v25 = vpop.permute.xlu1 %814 }
 0x566   : > { %818 = vst.msk [vmem:[#allocation2] sm:$0xff] %vm817_vm4, %v815_v25 }
 0x56d   : > { %v931_v26 = vpop.permute.xlu0 %930 }
 0x56e   : > { %934 = vst.msk [vmem:[#allocation2] sm:$0xff] %vm933_vm5, %v931_v26 }
 0x575   : > { %v1047_v1 = vpop.permute.xlu1 %1046 }
 0x576   : > { %1050 = vst.msk [vmem:[#allocation2] sm:$0xff] %vm1049_vm6, %v1047_v1 }
 0x57d   : > { %v1051_v27 = vld [vmem:[#allocation2] sm:$0xff] }
 0x57e   : > { %v1052_v28 = vpack.c.bf16 %v1051_v27, %v1051_v27 }
 0x580   : > { %1466 = vmatmul.mubr.bf16.vlgmr.msra.gmra.mrb[12].mxu0 %v1052_v28 }
 0x653   : > { %v1158_v30 = vpop.f32.mrb[12].mxu0 }
 0x654   : > { %v1159_v31 = vadd.f32 %v1334_v29, %v1158_v30  ;;  %v1467_v32 = vpop.f32.mrb[13].mxu0 }
 0x655   : > { %v1161_v33 = vpop.f32.mrb[14].mxu0 }
 0x656   : > { %1164 = vst [vmem:[%s322_s13] sm:$0xff] %v1159_v31  ;;  %v1468_v34 = vpop.f32.mrb[15].mxu0  ;;  %v1165_v35 = vadd.f32 %v1159_v31, %v1708_v23  ;;  %v1344_v23 = vld [vmem:[%s1849_s6] ss:$0 sm:$0xff] }
 0x658   : > { %1168 = vadd.xlane.f32.xlu1 %v1165_v35 }
 0x6e5   : > { %v1169_v36 = vpop.xlane.xlu1 %1168 }
 0x6e6   : > { %v1171_v37 = vmul.f32 0.0078125, %v1169_v36 }
 0x6e8   : > { %v1172_v38 = vsub.f32 %v1165_v35, %v1171_v37 }
 0x6ea   : > { %v1173_v39 = vmul.f32 %v1172_v38, %v1172_v38 }
 0x6ec   : > { %1174 = vadd.xlane.f32.xlu0 %v1173_v39 }
 0x779   : > { %v1175_v40 = vpop.xlane.xlu0 %1174 }
 0x77a   : > { %v1176_v41 = vmul.f32 0.0078125, %v1175_v40 }
 0x77c   : > { %v1177_v42 = vadd.f32 1e-05, %v1176_v41 }
 0x77e   : > { %1552 = vrsqrt.f32 %v1177_v42 }
 0x788   : > { %v1553_v43 = vpop.eup %1552 }
 0x789   : > { %v1179_v45 = vmul.f32 %v1553_v43, %v1172_v38 }
 0x78b   : > { %v1186_v46 = vmul.f32 %v1343_v44, %v1179_v45 }
 0x78d   : > { %v1193_v47 = vadd.f32 %v1344_v23, %v1186_v46 }
 0x78f   : > { %v1194_v48 = vpack.c.bf16 %v1193_v47, %v1193_v47 }
 0x791   : > { %1195 = vst [vmem:[%s326_s20] sm:$0xf] %v1194_v48 }
 0x792 PF: > { %s20_s27 = sadd.s32 1, %s1592_s27  }
 0x793   : > { %p17_p3 = scmp.ge.s32.totalorder %s20_s27, 4  }
 0x795   :  { %19 = sbr.rel (!%p17_p3) target bundleno = 1 (0x1), region = 95 }
 0x79c   :  { %1229 = vsyncpa [#allocation4], 1 }
 0x79d   :  { %1231 = vsyncpa [#allocation4 + $0x1], 1 }

</bundles_post_ra>
